<compile_context>
chip_gen: v7x
topology: tpu7x:2x2x1
jax: 0.10.0
libtpu: 0.0.40
codegen_flags: <defaults>
</compile_context>

<pallas_src>
import functools

import jax
import jax.numpy as jnp
from jax.experimental import pallas as pl
from jax.experimental.pallas import tpu as pltpu

D_IN = 6
H = 20
D_OUT = 8


def ffnnc_kernel(x_ref, w1_ref, b1_ref, w2_ref, b2_ref, w3_ref, b3_ref, o_ref):
    # Transposed ("batch on lane") layout:
    #   x_ref: (D_IN, TB), o_ref: (D_OUT, TB), weights in PyTorch layout (out, in),
    #   biases as (out, 1) columns broadcasting along the lane (batch) axis.
    # y^T = W3 @ tanh(W2 @ tanh(W1 @ x^T + b1) + b2) + b3
    x = x_ref[...]
    h1 = jnp.tanh(
        jnp.dot(w1_ref[...], x, preferred_element_type=jnp.float32) + b1_ref[...]
    )
    h2 = jnp.tanh(
        jnp.dot(w2_ref[...], h1, preferred_element_type=jnp.float32) + b2_ref[...]
    )
    y = jnp.dot(w3_ref[...], h2, preferred_element_type=jnp.float32) + b3_ref[...]
    o_ref[...] = y.astype(o_ref.dtype)


@functools.partial(jax.jit, static_argnames=("tile_b", "x_dtype"))
def ffnnc_forward(x, w1, b1, w2, b2, w3, b3, *, tile_b=1024, x_dtype=None):
    """Matches torch semantics: y = tanh(x @ W1.T + b1) -> tanh(. @ W2.T + b2) -> . @ W3.T + b3.

    x: (B, D_IN).  Weights in PyTorch layout: w_k (out, in), b_k (out,).
    """
    B = x.shape[0]
    if x_dtype is not None:
        x = x.astype(x_dtype)  # stream activations narrow; accumulate f32 on MXU

    # Lane-dense batch tile: multiple of 128, but don't over-pad tiny batches.
    tb = max(128, min(int(tile_b), pl.next_power_of_2(B)))
    tb = (tb // 128) * 128
    n_tiles = pl.cdiv(B, tb)
    bp = n_tiles * tb

    # Batch-on-lane layout + zero-pad the ragged last tile (wrapper-side plumbing;
    # a real pipeline would emit this layout from the producer).
    xt = jnp.zeros((D_IN, bp), x.dtype).at[:, :B].set(x.T)

    b1c = b1.reshape(H, 1).astype(jnp.float32)
    b2c = b2.reshape(H, 1).astype(jnp.float32)
    b3c = b3.reshape(D_OUT, 1).astype(jnp.float32)

    # Weights/biases: constant block index -> stay resident in VMEM across the grid.
    resident = lambda shape: pl.BlockSpec(shape, lambda i: (0, 0))

    yt = pl.pallas_call(
        ffnnc_kernel,
        out_shape=jax.ShapeDtypeStruct((D_OUT, bp), jnp.float32),
        grid=(n_tiles,),
        in_specs=[
            pl.BlockSpec((D_IN, tb), lambda i: (0, i)),  # streamed activation tile
            resident((H, D_IN)),
            resident((H, 1)),
            resident((H, H)),
            resident((H, 1)),
            resident((D_OUT, H)),
            resident((D_OUT, 1)),
        ],
        out_specs=pl.BlockSpec((D_OUT, tb), lambda i: (0, i)),
        compiler_params=pltpu.CompilerParams(
            # Batch tiles are independent -> megacore sharding on v7x, no-op on v5e/v6e.
            dimension_semantics=("parallel",),
        ),
    )(xt, w1, b1c, w2, b2c, w3, b3c)

    return yt[:, :B].T  # back to (B, D_OUT)


def init_params(key):
    """Deterministic init mimicking torch.nn.Linear (uniform(+/- 1/sqrt(fan_in)))."""
    ks = jax.random.split(key, 6)

    def linear(kw, kb, fan_in, fan_out):
        bound = 1.0 / (fan_in ** 0.5)
        w = jax.random.uniform(kw, (fan_out, fan_in), jnp.float32, -bound, bound)
        b = jax.random.uniform(kb, (fan_out,), jnp.float32, -bound, bound)
        return w, b

    w1, b1 = linear(ks[0], ks[1], D_IN, H)
    w2, b2 = linear(ks[2], ks[3], H, H)
    w3, b3 = linear(ks[4], ks[5], H, D_OUT)
    return w1, b1, w2, b2, w3, b3


def reference_forward(x, w1, b1, w2, b2, w3, b3):
    h1 = jnp.tanh(x @ w1.T + b1)
    h2 = jnp.tanh(h1 @ w2.T + b2)
    return h2 @ w3.T + b3


if __name__ == "__main__":
    key = jax.random.PRNGKey(0)
    kx, kp = jax.random.split(key)
    params = init_params(kp)

    # Small batch (single tile, padded to one lane-dense 128-wide tile).
    B = 8
    x = jax.random.normal(kx, (B, D_IN), jnp.float32)
    out = jax.block_until_ready(ffnnc_forward(x, *params))
    ref = reference_forward(x, *params)
    assert out.shape == (B, D_OUT)
    assert jnp.allclose(out, ref, atol=1e-5, rtol=1e-5), "f32 single-tile mismatch"

    # Ragged multi-tile batch: exercises the pipelined grid + last-tile padding.
    B2 = 300
    x2 = jax.random.normal(jax.random.fold_in(kx, 1), (B2, D_IN), jnp.float32)
    out2 = jax.block_until_ready(ffnnc_forward(x2, *params, tile_b=128))
    ref2 = reference_forward(x2, *params)
    assert out2.shape == (B2, D_OUT)
    assert jnp.allclose(out2, ref2, atol=1e-5, rtol=1e-5), "f32 multi-tile mismatch"

    # bf16-streamed activations (bandwidth win on v6e/v7x); f32 accumulation preserved.
    out3 = jax.block_until_ready(
        ffnnc_forward(x2, *params, tile_b=128, x_dtype=jnp.bfloat16)
    )
    assert jnp.allclose(out3, ref2, atol=5e-2, rtol=5e-2), "bf16 path mismatch"

    print("KERNEL_OK")
</pallas_src>

<mosaic_0001>
module attributes {stable_mosaic.version = 11 : i64} {
  func.func @ffnnc_kernel(%arg0: i32, %arg1: memref<6x128xf32, #tpu.memory_space<vmem>>, %arg2: memref<20x6xf32, #tpu.memory_space<vmem>>, %arg3: memref<20x1xf32, #tpu.memory_space<vmem>>, %arg4: memref<20x20xf32, #tpu.memory_space<vmem>>, %arg5: memref<20x1xf32, #tpu.memory_space<vmem>>, %arg6: memref<8x20xf32, #tpu.memory_space<vmem>>, %arg7: memref<8x1xf32, #tpu.memory_space<vmem>>, %arg8: memref<8x128xf32, #tpu.memory_space<vmem>>) attributes {dimension_semantics = [#tpu.dimension_semantics<parallel>], iteration_bounds = array<i64: 1>, scalar_prefetch = 0 : i64, scratch_operands = 0 : i64, tpu.core_type = #tpu.core_type<tc>, window_params = [{transform_indices = @transform_0, window_bounds = array<i64: 6, 128>}, {pipeline_mode = #tpu.pipeline_mode<synchronous>, transform_indices = @transform_1, window_bounds = array<i64: 20, 6>}, {pipeline_mode = #tpu.pipeline_mode<synchronous>, transform_indices = @transform_2, window_bounds = array<i64: 20, 1>}, {pipeline_mode = #tpu.pipeline_mode<synchronous>, transform_indices = @transform_3, window_bounds = array<i64: 20, 20>}, {pipeline_mode = #tpu.pipeline_mode<synchronous>, transform_indices = @transform_4, window_bounds = array<i64: 20, 1>}, {pipeline_mode = #tpu.pipeline_mode<synchronous>, transform_indices = @transform_5, window_bounds = array<i64: 8, 20>}, {pipeline_mode = #tpu.pipeline_mode<synchronous>, transform_indices = @transform_6, window_bounds = array<i64: 8, 1>}, {transform_indices = @transform_7, window_bounds = array<i64: 8, 128>}]} {
    %c0 = arith.constant 0 : index
    %c0_0 = arith.constant 0 : index
    %0 = vector.load %arg1[%c0, %c0_0] : memref<6x128xf32, #tpu.memory_space<vmem>>, vector<6x128xf32>
    %c0_1 = arith.constant 0 : index
    %c0_2 = arith.constant 0 : index
    %1 = vector.load %arg2[%c0_1, %c0_2] : memref<20x6xf32, #tpu.memory_space<vmem>>, vector<20x6xf32>
    %cst = arith.constant dense<0.000000e+00> : vector<20x128xf32>
    %2 = tpu.matmul %1, %0, %cst {dimension_numbers = #tpu.dot_dimension_numbers<[1], [0], [0], [1], [0, 0, 1, 1], [], []>} : vector<20x6xf32>, vector<6x128xf32>, vector<20x128xf32> -> vector<20x128xf32>
    %c0_3 = arith.constant 0 : index
    %c0_4 = arith.constant 0 : index
    %3 = vector.load %arg3[%c0_3, %c0_4] : memref<20x1xf32, #tpu.memory_space<vmem>>, vector<20x1xf32>
    %4 = vector.broadcast %3 : vector<20x1xf32> to vector<20x128xf32>
    %5 = arith.addf %2, %4 : vector<20x128xf32>
    %6 = math.tanh %5 : vector<20x128xf32>
    %c0_5 = arith.constant 0 : index
    %c0_6 = arith.constant 0 : index
    %7 = vector.load %arg4[%c0_5, %c0_6] : memref<20x20xf32, #tpu.memory_space<vmem>>, vector<20x20xf32>
    %cst_7 = arith.constant dense<0.000000e+00> : vector<20x128xf32>
    %8 = tpu.matmul %7, %6, %cst_7 {dimension_numbers = #tpu.dot_dimension_numbers<[1], [0], [0], [1], [0, 0, 1, 1], [], []>} : vector<20x20xf32>, vector<20x128xf32>, vector<20x128xf32> -> vector<20x128xf32>
    %c0_8 = arith.constant 0 : index
    %c0_9 = arith.constant 0 : index
    %9 = vector.load %arg5[%c0_8, %c0_9] : memref<20x1xf32, #tpu.memory_space<vmem>>, vector<20x1xf32>
    %10 = vector.broadcast %9 : vector<20x1xf32> to vector<20x128xf32>
    %11 = arith.addf %8, %10 : vector<20x128xf32>
    %12 = math.tanh %11 : vector<20x128xf32>
    %c0_10 = arith.constant 0 : index
    %c0_11 = arith.constant 0 : index
    %13 = vector.load %arg6[%c0_10, %c0_11] : memref<8x20xf32, #tpu.memory_space<vmem>>, vector<8x20xf32>
    %cst_12 = arith.constant dense<0.000000e+00> : vector<8x128xf32>
    %14 = tpu.matmul %13, %12, %cst_12 {dimension_numbers = #tpu.dot_dimension_numbers<[1], [0], [0], [1], [0, 0, 1, 1], [], []>} : vector<8x20xf32>, vector<20x128xf32>, vector<8x128xf32> -> vector<8x128xf32>
    %c0_13 = arith.constant 0 : index
    %c0_14 = arith.constant 0 : index
    %15 = vector.load %arg7[%c0_13, %c0_14] : memref<8x1xf32, #tpu.memory_space<vmem>>, vector<8x1xf32>
    %16 = vector.broadcast %15 : vector<8x1xf32> to vector<8x128xf32>
    %17 = arith.addf %14, %16 : vector<8x128xf32>
    %c0_15 = arith.constant 0 : index
    %c0_16 = arith.constant 0 : index
    %18 = vector.load %arg8[%c0_15, %c0_16] : memref<8x128xf32, #tpu.memory_space<vmem>>, vector<8x128xf32>
    tpu.vector_store %arg8[%c0_15, %c0_16], %17 {strides = array<i32>} : memref<8x128xf32, #tpu.memory_space<vmem>>, vector<8x128xf32>,
    return
  }
  func.func @transform_0(%arg0: i32) -> (i32, i32) {
    %c0_i32 = arith.constant 0 : i32
    %c0_i32_0 = arith.constant 0 : i32
    return %c0_i32, %arg0 : i32, i32
  }
  func.func @transform_1(%arg0: i32) -> (i32, i32) {
    %c0_i32 = arith.constant 0 : i32
    %c0_i32_0 = arith.constant 0 : i32
    %c0_i32_1 = arith.constant 0 : i32
    return %c0_i32, %c0_i32_0 : i32, i32
  }
  func.func @transform_2(%arg0: i32) -> (i32, i32) {
    %c0_i32 = arith.constant 0 : i32
    %c0_i32_0 = arith.constant 0 : i32
    %c0_i32_1 = arith.constant 0 : i32
    return %c0_i32, %c0_i32_0 : i32, i32
  }
  func.func @transform_3(%arg0: i32) -> (i32, i32) {
    %c0_i32 = arith.constant 0 : i32
    %c0_i32_0 = arith.constant 0 : i32
    %c0_i32_1 = arith.constant 0 : i32
    return %c0_i32, %c0_i32_0 : i32, i32
  }
  func.func @transform_4(%arg0: i32) -> (i32, i32) {
    %c0_i32 = arith.constant 0 : i32
    %c0_i32_0 = arith.constant 0 : i32
    %c0_i32_1 = arith.constant 0 : i32
    return %c0_i32, %c0_i32_0 : i32, i32
  }
  func.func @transform_5(%arg0: i32) -> (i32, i32) {
    %c0_i32 = arith.constant 0 : i32
    %c0_i32_0 = arith.constant 0 : i32
    %c0_i32_1 = arith.constant 0 : i32
    return %c0_i32, %c0_i32_0 : i32, i32
  }
  func.func @transform_6(%arg0: i32) -> (i32, i32) {
    %c0_i32 = arith.constant 0 : i32
    %c0_i32_0 = arith.constant 0 : i32
    %c0_i32_1 = arith.constant 0 : i32
    return %c0_i32, %c0_i32_0 : i32, i32
  }
  func.func @transform_7(%arg0: i32) -> (i32, i32) {
    %c0_i32 = arith.constant 0 : i32
    %c0_i32_0 = arith.constant 0 : i32
    return %c0_i32, %arg0 : i32, i32
  }
}

</mosaic_0001>

<bundles_post_ra>
// kernel: ffnnc_forward.1
= control target key start
LH: loop header
LB: loop body
LE: loop exit
PB: predicated region body
PF: predicated region fallthrough
CT: control target
= control target key end

     0   :  { %vm58_vm0 = vcmask 1045504   ;;  %vm48_vm1 = vcmask 48128   ;;  %v434_v0 = vmov 0.0   ;;  %vm435_vm2 = vmmov 0   ;;  %s552_s0 = inlined_call_operand.vmem [shape: f32[6,128], index: 0, kind: input, shape index: {}]   ;;  %s553_s1 = inlined_call_operand.vmem [shape: f32[20,6], index: 1, kind: input, shape index: {}]   ;;  %s554_s2 = inlined_call_operand.vmem [shape: f32[20,1], index: 2, kind: input, shape index: {}]   ;;  %s555_s4 = inlined_call_operand.vmem [shape: f32[20,1], index: 4, kind: input, shape index: {}]   ;;  %s556_s6 = inlined_call_operand.vmem [shape: f32[8,1], index: 6, kind: input, shape index: {}]   ;;  %s557_s3 = inlined_call_operand.vmem [shape: f32[20,20], index: 3, kind: input, shape index: {}]   ;;  %s558_s5 = inlined_call_operand.vmem [shape: f32[8,20], index: 5, kind: input, shape index: {}]   ;;  %s559_s7 = inlined_call_operand.vmem [shape: f32[8,128], index: 7, kind: output, shape index: {}]  }
   0x1   :  { %375 = vmatprep.subr.mxu0 %v434_v0  ;;  %v26_v1 = vld [vmem:[%s552_s0] sm:$0x3f]  ;;  %377 = vmatprep.mubr.msk.f32.mxu0 %vm435_vm2, %v434_v0  ;;  %v436_v3 = vmov 0   ;;  %v32_v5 = vld [vmem:[%s554_s2 + $0x10] sm:$0xf]  ;;  %v28_v6 = vld [vmem:[%s553_s1 + $0x8] sm:$0xff] }
   0x2   :  { %v27_v2 = vld [vmem:[%s553_s1] sm:$0xff]  ;;  %376 = vmatpush3.msk.msra.mxu0 %vm58_vm0, %v26_v1  ;;  %420 = vset.pattern.permute.xlu0 %v436_v3  ;;  %v31_v7 = vld [vmem:[%s554_s2 + $0x8] sm:$0xff]  ;;  %v29_v9 = vld [vmem:[%s553_s1 + $0x10] sm:$0xf]  ;;  %v437_v13 = vmov 0.0|0.0   ;;  %vm176_vm3 = vcmask 1043456  }
   0x3   :  { %v30_v4 = vld [vmem:[%s554_s2] sm:$0xff]  ;;  %378 = vmatmul.mubr.msk.f32.vlgmr.msra.gmra.mrb[0].mxu0 %vm48_vm1, %v27_v2  ;;  %421 = vset.pattern.permute.xlu1 %v436_v3  ;;  %v149_v10 = vld [vmem:[%s555_s4 + $0x8] sm:$0xff]  ;;  %v150_v11 = vld [vmem:[%s555_s4 + $0x10] sm:$0xf]  ;;  %vm166_vm4 = vcmask 162816  }
   0x4   :  { %35 = vperm.xlu0 %420, %v30_v4   ;;  %380 = vmatprep.mubr.msk.f32.mxu0 %vm435_vm2, %v434_v0  ;;  %v148_v8 = vld [vmem:[%s555_s4] sm:$0xff]  ;;  %v146_v31 = vld [vmem:[%s557_s3 + $0x8] sm:$0xff]  ;;  %v147_v32 = vld [vmem:[%s557_s3 + $0x10] sm:$0xf] }
   0x5   :  { %45 = vperm.xlu1 %421, %v32_v5   ;;  %392 = vmatprep.mubr.msk.f32.mxu1 %vm435_vm2, %v434_v0  ;;  %v264_v12 = vld [vmem:[%s556_s6] sm:$0xff] }
   0x6   :  { %410 = vmatprep.subr.bf16.mxu1 %v437_v13  ;;  %413 = vmatprep.subr.bf16.mxu0 %v437_v13  ;;  %v145_v30 = vld [vmem:[%s557_s3] sm:$0xff] }
   0x7   :  { %381 = vmatmul.mubr.msk.f32.gmra.mrb[2].mxu0 %vm48_vm1, %v28_v6  ;;  %v263_v48 = vld [vmem:[%s558_s5] sm:$0xff] }
   0x8   :  { %40 = vperm.xlu0 %420, %v31_v7   ;;  %383 = vmatprep.mubr.msk.f32.mxu0 %vm435_vm2, %v434_v0 }
   0x9   :  { %153 = vperm.xlu1 %421, %v148_v8  }
   0xb   :  { %384 = vmatmul.mubr.msk.f32.gmra.mrb[4].mxu0 %vm48_vm1, %v29_v9 }
   0xc   :  { %158 = vperm.xlu0 %420, %v149_v10   ;;  %407 = vmatprep.mubr.msk.f32.mxu0 %vm435_vm2, %v434_v0 }
   0xd   :  { %163 = vperm.xlu1 %421, %v150_v11  }
  0x10   :  { %267 = vperm.xlu0 %420, %v264_v12  }
  0x83   :  { %v36_v14 = vpop.permute.xlu0 %35 }
  0x84   :  { %v46_v22 = vpop.permute.xlu1 %45 }
  0x87   :  { %v41_v18 = vpop.permute.xlu0 %40 }
  0x88   :  { %v154_v34 = vpop.permute.xlu1 %153 }
  0x8b   :  { %v159_v37 = vpop.permute.xlu0 %158 }
  0x8c   :  { %v164_v41 = vpop.permute.xlu1 %163 }
  0x8f   :  { %v268_v50 = vpop.permute.xlu0 %267 }
  0xd6   :  { %v128_v15 = vpop.f32.mrb[0].mxu0 }
  0xd7   :  { %v379_v16 = vpop.f32.mrb[1].mxu0  ;;  %v129_v17 = vadd.f32 %v128_v15, %v36_v14 }
  0xd9   :  { %422 = vtanh.f32 %v129_v17 }
  0xda   :  { %v133_v19 = vpop.f32.mrb[2].mxu0 }
  0xdb   :  { %v134_v20 = vadd.f32 %v133_v19, %v41_v18  ;;  %v382_v21 = vpop.f32.mrb[3].mxu0 }
  0xdd   :  { %424 = vtanh.f32 %v134_v20 }
  0xde   :  { %v138_v23 = vpop.f32.mrb[4].mxu0 }
  0xdf   :  { %v139_v24 = vadd.f32 %v138_v23, %v46_v22  ;;  %v385_v25 = vpop.f32.mrb[5].mxu0 }
  0xe1   :  { %426 = vtanh.f32 %v139_v24 }
  0xe3   :  { %v423_v26 = vpop.eup %422 }
  0xe7   :  { %v425_v27 = vpop.eup %424 }
  0xe8   :  { %v411_v28 = vpack.c.bf16 %v425_v27, %v423_v26 }
  0xea   :  { %412 = vmatpush3.bf16.msra.mxu1 %v411_v28 }
  0xeb   :  { %v427_v29 = vpop.eup %426  ;;  %390 = vmatprep.subr.mxu1 %v434_v0 }
  0xee   :  { %391 = vmatpush3.msk.msra.mxu1 %vm176_vm3, %v427_v29 }
  0xef   :  { %393 = vmatmul.mubr.msk.f32.vlgmr.msra.gmra.mrb[0].mxu1 %vm166_vm4, %v145_v30 }
  0xf0   :  { %395 = vmatprep.mubr.msk.f32.mxu1 %vm435_vm2, %v434_v0 }
  0xf3   :  { %396 = vmatmul.mubr.msk.f32.gmra.mrb[2].mxu1 %vm166_vm4, %v146_v31 }
  0xf4   :  { %398 = vmatprep.mubr.msk.f32.mxu1 %vm435_vm2, %v434_v0 }
  0xf7   :  { %399 = vmatmul.mubr.msk.f32.gmra.mrb[4].mxu1 %vm166_vm4, %v147_v32 }
 0x1c2   :  { %v246_v33 = vpop.f32.mrb[0].mxu1 }
 0x1c3   :  { %v394_v35 = vpop.f32.mrb[1].mxu1  ;;  %v247_v36 = vadd.f32 %v246_v33, %v154_v34 }
 0x1c5   :  { %428 = vtanh.f32 %v247_v36 }
 0x1c6   :  { %v251_v38 = vpop.f32.mrb[2].mxu1 }
 0x1c7   :  { %v252_v39 = vadd.f32 %v251_v38, %v159_v37  ;;  %v397_v40 = vpop.f32.mrb[3].mxu1 }
 0x1c9   :  { %430 = vtanh.f32 %v252_v39 }
 0x1ca   :  { %v256_v42 = vpop.f32.mrb[4].mxu1 }
 0x1cb   :  { %v257_v43 = vadd.f32 %v256_v42, %v164_v41  ;;  %v400_v44 = vpop.f32.mrb[5].mxu1 }
 0x1cd   :  { %432 = vtanh.f32 %v257_v43 }
 0x1cf   :  { %v429_v45 = vpop.eup %428 }
 0x1d3   :  { %v431_v46 = vpop.eup %430 }
 0x1d4   :  { %v414_v47 = vpack.c.bf16 %v431_v46, %v429_v45 }
 0x1d6   :  { %415 = vmatpush3.bf16.msra.mxu0 %v414_v47 }
 0x1d7   :  { %405 = vmatprep.subr.mxu0 %v434_v0  ;;  %v433_v49 = vpop.eup %432 }
 0x1da   :  { %406 = vmatpush3.msk.msra.mxu0 %vm176_vm3, %v433_v49 }
 0x1db   :  { %408 = vmatmul.mubr.msk.f32.vlgmr.msra.gmra.mrb[6].mxu0 %vm166_vm4, %v263_v48 }
 0x2ae   :  { %v342_v51 = vpop.f32.mrb[6].mxu0 }
 0x2af   :  { %v343_v52 = vadd.f32 %v342_v51, %v268_v50  ;;  %v409_v53 = vpop.f32.mrb[7].mxu0 }
 0x2b1   :  { %346 = vst [vmem:[%s559_s7] sm:$0xff] %v343_v52 }

</bundles_post_ra>
